<compile_context>
chip_gen: v7x
topology: tpu7x:2x2x1
jax: 0.10.0
libtpu: 0.0.40
codegen_flags: <defaults>
</compile_context>

<pallas_src>
import functools
import math

import jax
import jax.numpy as jnp
from jax.experimental import pallas as pl
from jax.experimental.pallas import tpu as pltpu

# Raise scoped VMEM above the 16/32/32 MiB defaults, stay < 64 MiB (v7x physical).
_VMEM_LIMIT_BYTES = 48 * 1024 * 1024
_MAX_ROW_TILE = 512  # rows (batch*seq) per grid step for row-tiled kernels


def _round_up(n: int, m: int) -> int:
    return ((n + m - 1) // m) * m


def _pick_row_tile(rows: int) -> int:
    # Big tiles amortize the ~0.35us per-grid-step overhead; clamp (8-aligned)
    # for small problems so block == full array and no (8,128) issues arise.
    return min(_MAX_ROW_TILE, _round_up(rows, 8))


def _compiler_params(n_grid_axes: int) -> pltpu.CompilerParams:
    return pltpu.CompilerParams(
        dimension_semantics=("parallel",) * n_grid_axes,
        vmem_limit_bytes=_VMEM_LIMIT_BYTES,
    )


# --------------------------------------------------------------------------
# Kernels
# --------------------------------------------------------------------------
def _rmsnorm_matmul_kernel(x_ref, g_ref, w_ref, o_ref, *, eps):
    x = x_ref[...].astype(jnp.float32)                       # (tm, D)
    inv = jax.lax.rsqrt(jnp.mean(x * x, axis=-1, keepdims=True) + eps)
    xn = x * inv * g_ref[...].astype(jnp.float32)            # RMSNorm * weight
    o_ref[...] = jnp.dot(
        xn, w_ref[...].astype(jnp.float32),
        preferred_element_type=jnp.float32).astype(o_ref.dtype)


def _rmsnorm_swiglu_kernel(x_ref, g_ref, w1_ref, w3_ref, o_ref, *, eps):
    x = x_ref[...].astype(jnp.float32)                       # (tm, D)
    inv = jax.lax.rsqrt(jnp.mean(x * x, axis=-1, keepdims=True) + eps)
    xn = x * inv * g_ref[...].astype(jnp.float32)
    gate = jnp.dot(xn, w1_ref[...].astype(jnp.float32),
                   preferred_element_type=jnp.float32)
    up = jnp.dot(xn, w3_ref[...].astype(jnp.float32),
                 preferred_element_type=jnp.float32)
    o_ref[...] = (gate * jax.nn.sigmoid(gate) * up).astype(o_ref.dtype)


def _matmul_residual_kernel(y_ref, w_ref, r_ref, o_ref):
    acc = jnp.dot(y_ref[...].astype(jnp.float32),
                  w_ref[...].astype(jnp.float32),
                  preferred_element_type=jnp.float32)
    o_ref[...] = (r_ref[...].astype(jnp.float32) + acc).astype(o_ref.dtype)


def _attention_kernel(qr_ref, qi_ref, kr_ref, ki_ref, v_ref, cos_ref, sin_ref,
                      o_ref, *, scale):
    # One (batch, head) per grid step; full sequence resident in VMEM.
    qr = qr_ref[0, 0].astype(jnp.float32)                    # (S, hd/2)
    qi = qi_ref[0, 0].astype(jnp.float32)
    kr = kr_ref[0, 0].astype(jnp.float32)
    ki = ki_ref[0, 0].astype(jnp.float32)
    v = v_ref[0, 0].astype(jnp.float32)                      # (S, hd)
    cos = cos_ref[...].astype(jnp.float32)                   # (S, hd/2)
    sin = sin_ref[...].astype(jnp.float32)

    # Rotary on de-interleaved (real, imag) halves. q.k is invariant to the
    # head-dim permutation as long as q and k use the same one; v keeps the
    # original interleaved layout so the output feeds wo correctly.
    qr_r = qr * cos - qi * sin
    qi_r = qr * sin + qi * cos
    kr_r = kr * cos - ki * sin
    ki_r = kr * sin + ki * cos

    s = (jnp.dot(qr_r, kr_r.T, preferred_element_type=jnp.float32)
         + jnp.dot(qi_r, ki_r.T, preferred_element_type=jnp.float32)) * scale

    seq = s.shape[0]
    row = jax.lax.broadcasted_iota(jnp.int32, (seq, seq), 0)
    col = jax.lax.broadcasted_iota(jnp.int32, (seq, seq), 1)
    s = jnp.where(col <= row, s, -jnp.inf)                   # causal mask

    m = jnp.max(s, axis=-1, keepdims=True)
    p = jnp.exp(s - m)
    p = p / jnp.sum(p, axis=-1, keepdims=True)
    o_ref[0, 0] = jnp.dot(p, v,
                          preferred_element_type=jnp.float32).astype(o_ref.dtype)


# --------------------------------------------------------------------------
# Wrappers (row-tiled, pad instead of asserting divisibility)
# --------------------------------------------------------------------------
def fused_rmsnorm_matmul(x2, gamma, w, eps):
    rows, d = x2.shape
    n = w.shape[1]
    tile = _pick_row_tile(rows)
    padded = _round_up(rows, tile)
    if padded != rows:
        x2 = jnp.pad(x2, ((0, padded - rows), (0, 0)))
    out = pl.pallas_call(
        functools.partial(_rmsnorm_matmul_kernel, eps=eps),
        out_shape=jax.ShapeDtypeStruct((padded, n), x2.dtype),
        grid_spec=pltpu.PrefetchScalarGridSpec(
            num_scalar_prefetch=0,
            grid=(padded // tile,),
            in_specs=[
                pl.BlockSpec((tile, d), lambda i: (i, 0)),
                pl.BlockSpec((1, d), lambda i: (0, 0)),
                pl.BlockSpec((d, n), lambda i: (0, 0)),
            ],
            out_specs=pl.BlockSpec((tile, n), lambda i: (i, 0)),
        ),
        compiler_params=_compiler_params(1),
    )(x2, gamma.reshape(1, d), w)
    return out[:rows]


def fused_rmsnorm_swiglu(x2, gamma, w1, w3, eps):
    rows, d = x2.shape
    hdim = w1.shape[1]
    tile = _pick_row_tile(rows)
    padded = _round_up(rows, tile)
    if padded != rows:
        x2 = jnp.pad(x2, ((0, padded - rows), (0, 0)))
    out = pl.pallas_call(
        functools.partial(_rmsnorm_swiglu_kernel, eps=eps),
        out_shape=jax.ShapeDtypeStruct((padded, hdim), x2.dtype),
        grid_spec=pltpu.PrefetchScalarGridSpec(
            num_scalar_prefetch=0,
            grid=(padded // tile,),
            in_specs=[
                pl.BlockSpec((tile, d), lambda i: (i, 0)),
                pl.BlockSpec((1, d), lambda i: (0, 0)),
                pl.BlockSpec((d, hdim), lambda i: (0, 0)),
                pl.BlockSpec((d, hdim), lambda i: (0, 0)),
            ],
            out_specs=pl.BlockSpec((tile, hdim), lambda i: (i, 0)),
        ),
        compiler_params=_compiler_params(1),
    )(x2, gamma.reshape(1, d), w1, w3)
    return out[:rows]


def matmul_residual(y2, w, res2):
    rows, k = y2.shape
    n = w.shape[1]
    tile = _pick_row_tile(rows)
    padded = _round_up(rows, tile)
    if padded != rows:
        pad = ((0, padded - rows), (0, 0))
        y2 = jnp.pad(y2, pad)
        res2 = jnp.pad(res2, pad)
    out = pl.pallas_call(
        _matmul_residual_kernel,
        out_shape=jax.ShapeDtypeStruct((padded, n), res2.dtype),
        grid_spec=pltpu.PrefetchScalarGridSpec(
            num_scalar_prefetch=0,
            grid=(padded // tile,),
            in_specs=[
                pl.BlockSpec((tile, k), lambda i: (i, 0)),
                pl.BlockSpec((k, n), lambda i: (0, 0)),
                pl.BlockSpec((tile, n), lambda i: (i, 0)),
            ],
            out_specs=pl.BlockSpec((tile, n), lambda i: (i, 0)),
        ),
        compiler_params=_compiler_params(1),
    )(y2, w, res2)
    return out[:rows]


def causal_rotary_attention(q, k, v, freqs_cos, freqs_sin, *, n_rep):
    # q: (B, S, H, hd); k, v: (B, S, KH, hd); freqs: (S, hd/2)
    b, s, h, hd = q.shape
    kh = k.shape[2]
    hd2 = hd // 2
    scale = 1.0 / math.sqrt(hd)

    # De-interleave head_dim into (real, imag) halves (pure layout work) and
    # put heads before the sequence axis.
    qp = q.reshape(b, s, h, hd2, 2).transpose(0, 2, 1, 3, 4)     # (B,H,S,hd2,2)
    q_r, q_i = qp[..., 0], qp[..., 1]
    kp = k.reshape(b, s, kh, hd2, 2).transpose(0, 2, 1, 3, 4)    # (B,KH,S,hd2,2)
    k_r, k_i = kp[..., 0], kp[..., 1]
    v_t = v.transpose(0, 2, 1, 3)                                # (B,KH,S,hd)

    out = pl.pallas_call(
        functools.partial(_attention_kernel, scale=scale),
        out_shape=jax.ShapeDtypeStruct((b, h, s, hd), q.dtype),
        grid_spec=pltpu.PrefetchScalarGridSpec(
            num_scalar_prefetch=0,
            grid=(b, h),
            in_specs=[
                pl.BlockSpec((1, 1, s, hd2), lambda bi, hi: (bi, hi, 0, 0)),
                pl.BlockSpec((1, 1, s, hd2), lambda bi, hi: (bi, hi, 0, 0)),
                pl.BlockSpec((1, 1, s, hd2),
                             lambda bi, hi: (bi, hi // n_rep, 0, 0)),
                pl.BlockSpec((1, 1, s, hd2),
                             lambda bi, hi: (bi, hi // n_rep, 0, 0)),
                pl.BlockSpec((1, 1, s, hd),
                             lambda bi, hi: (bi, hi // n_rep, 0, 0)),
                pl.BlockSpec((s, hd2), lambda bi, hi: (0, 0)),
                pl.BlockSpec((s, hd2), lambda bi, hi: (0, 0)),
            ],
            out_specs=pl.BlockSpec((1, 1, s, hd),
                                   lambda bi, hi: (bi, hi, 0, 0)),
        ),
        compiler_params=_compiler_params(2),
    )(q_r, q_i, k_r, k_i, v_t, freqs_cos, freqs_sin)
    return out.transpose(0, 2, 1, 3).reshape(b, s, h * hd)


def transformer_block(x, freqs_cos, freqs_sin, params, *, eps, n_heads,
                      n_kv_heads):
    # TODO(synk): dropout (p=0.0 default) not implemented — eval-mode identity.
    b, s, d = x.shape
    hd = d // n_heads
    n_rep = n_heads // n_kv_heads
    rows = b * s
    x2 = x.reshape(rows, d)

    # Attention branch: fused attention_norm + concatenated QKV projection.
    wqkv = jnp.concatenate([params["wq"], params["wk"], params["wv"]], axis=1)
    qkv = fused_rmsnorm_matmul(x2, params["attn_norm"], wqkv, eps)
    qd = n_heads * hd
    kvd = n_kv_heads * hd
    q = qkv[:, :qd].reshape(b, s, n_heads, hd)
    k = qkv[:, qd:qd + kvd].reshape(b, s, n_kv_heads, hd)
    v = qkv[:, qd + kvd:].reshape(b, s, n_kv_heads, hd)

    attn = causal_rotary_attention(q, k, v, freqs_cos, freqs_sin, n_rep=n_rep)
    h2 = matmul_residual(attn.reshape(rows, qd), params["wo"], x2)

    # FFN branch: fused ffn_norm + SwiGLU, then down-projection + residual.
    gated = fused_rmsnorm_swiglu(h2, params["ffn_norm"], params["w1"],
                                 params["w3"], eps)
    out2 = matmul_residual(gated, params["w2"], h2)
    return out2.reshape(b, s, d)


# --------------------------------------------------------------------------
# Pure-JAX reference (mirrors the PyTorch module op-for-op)
# --------------------------------------------------------------------------
def transformer_block_ref(x, freqs_cos, freqs_sin, params, *, eps, n_heads,
                          n_kv_heads):
    b, s, d = x.shape
    hd = d // n_heads
    n_rep = n_heads // n_kv_heads

    def rmsnorm(t, w):
        tf = t.astype(jnp.float32)
        inv = jax.lax.rsqrt(jnp.mean(tf * tf, axis=-1, keepdims=True) + eps)
        return (tf * inv).astype(t.dtype) * w

    xn = rmsnorm(x, params["attn_norm"])
    q = (xn @ params["wq"]).reshape(b, s, n_heads, hd)
    k = (xn @ params["wk"]).reshape(b, s, n_kv_heads, hd)
    v = (xn @ params["wv"]).reshape(b, s, n_kv_heads, hd)

    def rot(t):
        tr = t.reshape(t.shape[:-1] + (hd // 2, 2))
        t_r, t_i = tr[..., 0], tr[..., 1]
        cos = freqs_cos[None, :, None, :]
        sin = freqs_sin[None, :, None, :]
        o_r = t_r * cos - t_i * sin
        o_i = t_r * sin + t_i * cos
        return jnp.stack([o_r, o_i], axis=-1).reshape(t.shape)

    q, k = rot(q), rot(k)
    if n_rep > 1:
        k = jnp.repeat(k, n_rep, axis=2)
        v = jnp.repeat(v, n_rep, axis=2)

    q = q.transpose(0, 2, 1, 3)
    k = k.transpose(0, 2, 1, 3)
    v = v.transpose(0, 2, 1, 3)
    scores = jnp.einsum("bhqd,bhkd->bhqk", q, k) / math.sqrt(hd)
    mask = jnp.triu(jnp.full((s, s), -jnp.inf, dtype=jnp.float32), k=1)
    scores = scores + mask[None, None]
    probs = jax.nn.softmax(scores.astype(jnp.float32), axis=-1).astype(q.dtype)
    attn = jnp.einsum("bhqk,bhkd->bhqd", probs, v)
    attn = attn.transpose(0, 2, 1, 3).reshape(b, s, n_heads * hd)
    h = x + attn @ params["wo"]

    hn = rmsnorm(h, params["ffn_norm"])
    gate = hn @ params["w1"]
    up = hn @ params["w3"]
    ffn = (gate * jax.nn.sigmoid(gate) * up) @ params["w2"]
    return h + ffn


if __name__ == "__main__":
    # Full-f32 matmuls on both the XLA reference and the Pallas kernels so the
    # tolerance check compares like with like.
    jax.config.update("jax_default_matmul_precision", "highest")

    key = jax.random.PRNGKey(0)
    B, S, D = 2, 8, 64
    n_heads, n_kv_heads = 4, 2          # GQA: n_rep = 2
    hd = D // n_heads                   # 16
    hidden = 128
    eps = 1e-5

    keys = jax.random.split(key, 10)

    def w(k_, shape):
        return jax.random.normal(k_, shape, dtype=jnp.float32) * 0.05

    params = {
        "attn_norm": 1.0 + 0.1 * jax.random.normal(keys[0], (D,), jnp.float32),
        "ffn_norm": 1.0 + 0.1 * jax.random.normal(keys[1], (D,), jnp.float32),
        "wq": w(keys[2], (D, n_heads * hd)),
        "wk": w(keys[3], (D, n_kv_heads * hd)),
        "wv": w(keys[4], (D, n_kv_heads * hd)),
        "wo": w(keys[5], (n_heads * hd, D)),
        "w1": w(keys[6], (D, hidden)),
        "w3": w(keys[7], (D, hidden)),
        "w2": w(keys[8], (hidden, D)),
    }
    x = jax.random.normal(keys[9], (B, S, D), dtype=jnp.float32)

    # Rotary tables (same precompute as llama's precompute_freqs_cis).
    inv_freq = 1.0 / (10000.0 ** (jnp.arange(0, hd, 2, dtype=jnp.float32) / hd))
    t = jnp.arange(S, dtype=jnp.float32)
    freqs = jnp.outer(t, inv_freq)                       # (S, hd/2)
    freqs_cos, freqs_sin = jnp.cos(freqs), jnp.sin(freqs)

    out = transformer_block(x, freqs_cos, freqs_sin, params, eps=eps,
                            n_heads=n_heads, n_kv_heads=n_kv_heads)
    out = jax.block_until_ready(out)

    ref = transformer_block_ref(x, freqs_cos, freqs_sin, params, eps=eps,
                                n_heads=n_heads, n_kv_heads=n_kv_heads)

    assert out.shape == x.shape and out.dtype == x.dtype
    err = float(jnp.max(jnp.abs(out - ref)))
    assert jnp.allclose(out, ref, atol=2e-4, rtol=2e-4), err

    print("KERNEL_OK")
</pallas_src>

<mosaic_0001>
module attributes {stable_mosaic.version = 11 : i64} {
  func.func @_rmsnorm_matmul_kernel(%arg0: i32, %arg1: memref<16x64xf32, #tpu.memory_space<vmem>>, %arg2: memref<1x64xf32, #tpu.memory_space<vmem>>, %arg3: memref<64x128xf32, #tpu.memory_space<vmem>>, %arg4: memref<16x128xf32, #tpu.memory_space<vmem>>) attributes {dimension_semantics = [#tpu.dimension_semantics<parallel>], iteration_bounds = array<i64: 1>, scalar_prefetch = 0 : i64, scratch_operands = 0 : i64, tpu.core_type = #tpu.core_type<tc>, window_params = [{transform_indices = @transform_0, window_bounds = array<i64: 16, 64>}, {pipeline_mode = #tpu.pipeline_mode<synchronous>, transform_indices = @transform_1, window_bounds = array<i64: 1, 64>}, {pipeline_mode = #tpu.pipeline_mode<synchronous>, transform_indices = @transform_2, window_bounds = array<i64: 64, 128>}, {transform_indices = @transform_3, window_bounds = array<i64: 16, 128>}]} {
    %c0 = arith.constant 0 : index
    %c0_0 = arith.constant 0 : index
    %0 = vector.load %arg1[%c0, %c0_0] : memref<16x64xf32, #tpu.memory_space<vmem>>, vector<16x64xf32>
    %1 = arith.mulf %0, %0 : vector<16x64xf32>
    %cst = arith.constant dense<0.000000e+00> : vector<16xf32>
    %2 = vector.multi_reduction <add>, %1, %cst [1] : vector<16x64xf32> to vector<16xf32>
    %3 = vector.shape_cast %2 : vector<16xf32> to vector<16x1xf32>
    %cst_1 = arith.constant 6.400000e+01 : f32
    %4 = vector.broadcast %cst_1 : f32 to vector<16x1xf32>
    %5 = arith.divf %3, %4 : vector<16x1xf32>
    %cst_2 = arith.constant 9.99999974E-6 : f32
    %6 = vector.broadcast %cst_2 : f32 to vector<16x1xf32>
    %7 = arith.addf %5, %6 : vector<16x1xf32>
    %8 = math.rsqrt %7 : vector<16x1xf32>
    %9 = vector.broadcast %8 : vector<16x1xf32> to vector<16x64xf32>
    %10 = arith.mulf %0, %9 : vector<16x64xf32>
    %c0_3 = arith.constant 0 : index
    %c0_4 = arith.constant 0 : index
    %11 = vector.load %arg2[%c0_3, %c0_4] : memref<1x64xf32, #tpu.memory_space<vmem>>, vector<1x64xf32>
    %12 = vector.broadcast %11 : vector<1x64xf32> to vector<16x64xf32>
    %13 = arith.mulf %10, %12 : vector<16x64xf32>
    %c0_5 = arith.constant 0 : index
    %c0_6 = arith.constant 0 : index
    %14 = vector.load %arg3[%c0_5, %c0_6] : memref<64x128xf32, #tpu.memory_space<vmem>>, vector<64x128xf32>
    %cst_7 = arith.constant dense<0.000000e+00> : vector<16x128xf32>
    %15 = tpu.matmul %13, %14, %cst_7 {dimension_numbers = #tpu.dot_dimension_numbers<[1], [0], [0], [1], [0, 0, 1, 1], [], []>, precision = #tpu.contract_precision<fp32>} : vector<16x64xf32>, vector<64x128xf32>, vector<16x128xf32> -> vector<16x128xf32>
    %c0_8 = arith.constant 0 : index
    %c0_9 = arith.constant 0 : index
    %16 = vector.load %arg4[%c0_8, %c0_9] : memref<16x128xf32, #tpu.memory_space<vmem>>, vector<16x128xf32>
    tpu.vector_store %arg4[%c0_8, %c0_9], %15 {strides = array<i32>} : memref<16x128xf32, #tpu.memory_space<vmem>>, vector<16x128xf32>,
    return
  }
  func.func @transform_0(%arg0: i32) -> (i32, i32) {
    %c0_i32 = arith.constant 0 : i32
    %c0_i32_0 = arith.constant 0 : i32
    return %arg0, %c0_i32 : i32, i32
  }
  func.func @transform_1(%arg0: i32) -> (i32, i32) {
    %c0_i32 = arith.constant 0 : i32
    %c0_i32_0 = arith.constant 0 : i32
    %c0_i32_1 = arith.constant 0 : i32
    return %c0_i32, %c0_i32_0 : i32, i32
  }
  func.func @transform_2(%arg0: i32) -> (i32, i32) {
    %c0_i32 = arith.constant 0 : i32
    %c0_i32_0 = arith.constant 0 : i32
    %c0_i32_1 = arith.constant 0 : i32
    return %c0_i32, %c0_i32_0 : i32, i32
  }
  func.func @transform_3(%arg0: i32) -> (i32, i32) {
    %c0_i32 = arith.constant 0 : i32
    %c0_i32_0 = arith.constant 0 : i32
    return %arg0, %c0_i32 : i32, i32
  }
}

</mosaic_0001>

<bundles_post_ra>
// kernel: tpu_custom_call.1
= control target key start
LH: loop header
LB: loop body
LE: loop exit
PB: predicated region body
PF: predicated region fallthrough
CT: control target
= control target key end

     0   :  { %8 = vsyncpa [#allocation3], 0  ;;  %s1187_s0 = inlined_call_operand.hbm [shape: f32[16,64], index: 0, kind: input, shape index: {}]   ;;  %s1188_s1 = inlined_call_operand.vmem [shape: f32[1,64], index: 1, kind: input, shape index: {}]   ;;  %s1189_s2 = inlined_call_operand.hbm [shape: f32[64,128], index: 2, kind: input, shape index: {}]   ;;  %s1190_s3 = inlined_call_operand.hbm [shape: f32[16,128], index: 3, kind: output, shape index: {}]  }
   0x1   :  { %9 = vsyncpa [#allocation6], 0 }
   0x2   :  { %10 = vsyncpa [#allocation4], 0  ;;  %s1048_s12 = smov [#allocation2]   ;;  %s976_s16 = scalar_lea.hbm %s1187_s0, 256 }
   0x3   :  { %s16_s13 = sshll.u32 %s1048_s12, 4  ;;  %p977_p0 = scmp.ne.s32.totalorder %s1187_s0, %s976_s16  ;;  %s17_s13 = int_to_ptr.vmem [resolvable:$true] %s16_s13 }
   0x4   :  { %p980_p1 = scmp.lt.u32.totalorder %s976_s16, %s1187_s0 }
   0x6   :  { %p982_p2 = pnand %p980_p1, %p977_p0 }
   0x8   :  { %985 = shalt.err (!%p982_p2)
}
   0x9   :  { %s986_s21 = scalar_lea.vmem %s17_s13, 256  ;;  %p991_p4 = scmp.lt.s32.totalorder %s17_s13, %s17_s13 }
   0xa   :  { %p987_p3 = scmp.ne.s32.totalorder %s17_s13, %s986_s21  ;;  %p992_p5 = scmp.lt.s32.totalorder %s986_s21, %s986_s21 }
   0xc   :  { %p993_p6 = por %p992_p5, %p991_p4 }
   0xe   :  { %p994_p7 = pnand %p993_p6, %p987_p3 }
  0x10   :  { %997 = shalt.err (!%p994_p7)
}
  0x11   :  { %s1049_s22 = smov 128   ;;  %s1050_s23 = smov 8  }
  0x12   :  { %22 = dma.hbm_to_vmem [thread:$0]  %s1187_s0, 256, %s17_s13, [#allocation3], %s1049_s22, %s1049_s22, %s1050_s23  }
  0x13   :  { %s1051_s26 = smov [#allocation5]   ;;  %s998_s30 = scalar_lea.hbm %s1189_s2, 1024 }
  0x14   :  { %s30_s27 = sshll.u32 %s1051_s26, 4  ;;  %p999_p8 = scmp.ne.s32.totalorder %s1189_s2, %s998_s30  ;;  %s31_s27 = int_to_ptr.vmem [resolvable:$true] %s30_s27 }
  0x15   :  { %p1002_p9 = scmp.lt.u32.totalorder %s998_s30, %s1189_s2 }
  0x17   :  { %p1004_p10 = pnand %p1002_p9, %p999_p8 }
  0x19   :  { %1007 = shalt.err (!%p1004_p10)
}
  0x1a   :  { %s1008_s8 = scalar_lea.vmem %s31_s27, 1024  ;;  %p1013_p12 = scmp.lt.s32.totalorder %s31_s27, %s31_s27 }
  0x1b   :  { %p1009_p11 = scmp.ne.s32.totalorder %s31_s27, %s1008_s8  ;;  %p1014_p13 = scmp.lt.s32.totalorder %s1008_s8, %s1008_s8 }
  0x1d   :  { %p1015_p0 = por %p1014_p13, %p1013_p12 }
  0x1f   :  { %p1016_p1 = pnand %p1015_p0, %p1009_p11 }
  0x21   :  { %1019 = shalt.err (!%p1016_p1)
}
  0x22   :  { %36 = dma.hbm_to_vmem [thread:$0]  %s1189_s2, 1024, %s31_s27, [#allocation6], %s1049_s22, %s1049_s22, %s1050_s23  }
  0x23   :  { %1042 = dma.done.wait [#allocation3], 256  }
  0x24   :  { %1043 = vsyncadd [#allocation3], 4294967040 }
  0x25   :  { %1044 = dma.done.wait [#allocation6], 1024  }
  0x26   :  { %1045 = vsyncadd [#allocation6], 4294966272  ;;  %v1103_v0 = vld [vmem:[#allocation2] sm:$0xff]  ;;  %vm47_vm0 = vcmask 523264   ;;  %v1105_v1 = vld [vmem:[#allocation2 + $0x8] sm:$0xff] }
  0x27   :  { %v45_v2 = vmul.f32 %v1103_v0, %v1103_v0  ;;  %v46_v3 = vmul.f32 %v1105_v1, %v1105_v1  ;;  %v72_v6 = vld [vmem:[#allocation5] sm:$0xff]  ;;  %v73_v7 = vld [vmem:[#allocation5 + $0x8] sm:$0xff]  ;;  %v74_v11 = vld [vmem:[#allocation5 + $0x10] sm:$0xff] }
  0x28   :  { %v87_v8 = vand.u32 4294901760, %v72_v6  ;;  %v90_v9 = vand.u32 4294901760, %v73_v7  ;;  %v75_v12 = vld [vmem:[#allocation5 + $0x18] sm:$0xff]  ;;  %v93_v13 = vand.u32 4294901760, %v74_v11  ;;  %v76_v16 = vld [vmem:[#allocation5 + $0x20] sm:$0xff]  ;;  %v77_v17 = vld [vmem:[#allocation5 + $0x28] sm:$0xff] }
  0x29   :  { %v48_v4 = vsel %vm47_vm0, %v45_v2, 0.0  ;;  %v51_v5 = vsel %vm47_vm0, %v46_v3, 0.0  ;;  %v96_v14 = vand.u32 4294901760, %v75_v12  ;;  %v99_v18 = vand.u32 4294901760, %v76_v16  ;;  %v78_v21 = vld [vmem:[#allocation5 + $0x30] sm:$0xff]  ;;  %v79_v22 = vld [vmem:[#allocation5 + $0x38] sm:$0xff] }
  0x2a   :  { %49 = vadd.xlane.f32.xlu0 %v48_v4  ;;  %v1113_v10 = vpack.c.bf16 %v90_v9, %v87_v8  ;;  %v102_v19 = vand.u32 4294901760, %v77_v17  ;;  %v105_v23 = vand.u32 4294901760, %v78_v21  ;;  %v108_v24 = vand.u32 4294901760, %v79_v22 }
  0x2b   :  { %v1119_v15 = vpack.c.bf16 %v96_v14, %v93_v13  ;;  %v181_v26 = vsub.f32 %v72_v6, %v87_v8  ;;  %v188_v27 = vsub.f32 %v73_v7, %v90_v9  ;;  %v195_v33 = vsub.f32 %v74_v11, %v93_v13 }
  0x2c   :  { %910 = vmatprep.subr.bf16.mxu0 %v1113_v10  ;;  %862 = vmatprep.subr.bf16.mxu1 %v1113_v10  ;;  %v1125_v20 = vpack.c.bf16 %v102_v19, %v99_v18  ;;  %v1130_v25 = vpack.c.bf16 %v108_v24, %v105_v23  ;;  %v202_v34 = vsub.f32 %v75_v12, %v96_v14 }
  0x2d   :  { %912 = vmatpush3.bf16.msra.mxu0 %v1113_v10  ;;  %864 = vmatpush3.bf16.msra.mxu1 %v1113_v10  ;;  %v182_v28 = vand.u32 4294901760, %v181_v26  ;;  %v189_v29 = vand.u32 4294901760, %v188_v27  ;;  %v196_v37 = vand.u32 4294901760, %v195_v33  ;;  %v209_v43 = vsub.f32 %v76_v16, %v99_v18 }
  0x2e   :  { %52 = vadd.xlane.f32.xlu0 %v51_v5  ;;  %914 = vmatprep.subr.bf16.mxu0 %v1119_v15  ;;  %v203_v38 = vand.u32 4294901760, %v202_v34  ;;  %v216_v44 = vsub.f32 %v77_v17, %v102_v19  ;;  %v223_v50 = vsub.f32 %v78_v21, %v105_v23  ;;  %v230_v51 = vsub.f32 %v79_v22, %v108_v24  ;;  %v686_v17 = vld [vmem:[%s1188_s1] ss:$0 sm:$0xff]  ;;  %s1052_s1 = smov [#allocation7]  }
  0x2f   :  { %866 = vmatprep.subr.bf16.mxu1 %v1119_v15  ;;  %v1137_v30 = vpack.c.bf16 %v189_v29, %v182_v28  ;;  %v183_v31 = vsub.f32 %v181_v26, %v182_v28  ;;  %v190_v32 = vsub.f32 %v188_v27, %v189_v29  ;;  %v197_v41 = vsub.f32 %v195_v33, %v196_v37  ;;  %s673_s11 = sshll.u32 %s1052_s1, 4  ;;  %s674_s11 = int_to_ptr.vmem [resolvable:$true] %s673_s11 }
  0x30   :  { %v1142_v40 = vpack.c.bf16 %v203_v38, %v196_v37  ;;  %v204_v42 = vsub.f32 %v202_v34, %v203_v38  ;;  %v210_v47 = vand.u32 4294901760, %v209_v43  ;;  %v217_v48 = vand.u32 4294901760, %v216_v44  ;;  %s1020_s12 = scalar_lea.vmem %s674_s11, 256  ;;  %p1025_p3 = scmp.lt.s32.totalorder %s674_s11, %s674_s11 }
  0x31   :  { %916 = vmatpush3.bf16.msra.mxu0 %v1119_v15  ;;  %868 = vmatpush3.bf16.msra.mxu1 %v1119_v15  ;;  %v184_v35 = vand.u32 4294901760, %v183_v31  ;;  %v191_v36 = vand.u32 4294901760, %v190_v32  ;;  %v198_v45 = vand.u32 4294901760, %v197_v41  ;;  %v224_v55 = vand.u32 4294901760, %v223_v50  ;;  %p1021_p2 = scmp.ne.s32.totalorder %s674_s11, %s1020_s12  ;;  %p1026_p4 = scmp.lt.s32.totalorder %s1020_s12, %s1020_s12 }
  0x32   :  { %918 = vmatprep.subr.bf16.mxu0 %v1125_v20  ;;  %870 = vmatprep.subr.bf16.mxu1 %v1125_v20  ;;  %v205_v46 = vand.u32 4294901760, %v204_v42  ;;  %v933_v52 = vpack.c.bf16 %v217_v48, %v210_v47  ;;  %v211_v53 = vsub.f32 %v209_v43, %v210_v47  ;;  %v218_v54 = vsub.f32 %v216_v44, %v217_v48 }
  0x33   :  { %v1140_v39 = vpack.c.bf16 %v191_v36, %v184_v35  ;;  %v231_v56 = vand.u32 4294901760, %v230_v51  ;;  %v225_v60 = vsub.f32 %v223_v50, %v224_v55  ;;  %v893_v4 = vpack.c.bf16 %v188_v27, %v181_v26  ;;  %p1027_p5 = por %p1026_p4, %p1025_p3 }
  0x34   :  { %v881_v49 = vpack.c.bf16 %v205_v46, %v198_v45  ;;  %v212_v57 = vand.u32 4294901760, %v211_v53  ;;  %v219_v58 = vand.u32 4294901760, %v218_v54  ;;  %v897_v5 = vpack.c.bf16 %v202_v34, %v195_v33 }
  0x35   :  { %920 = vmatpush3.bf16.msra.mxu0 %v1125_v20  ;;  %872 = vmatpush3.bf16.msra.mxu1 %v1125_v20  ;;  %v937_v59 = vpack.c.bf16 %v231_v56, %v224_v55  ;;  %v232_v61 = vsub.f32 %v230_v51, %v231_v56  ;;  %v226_v63 = vand.u32 4294901760, %v225_v60  ;;  %v1145_v6 = vpack.c.bf16 %v216_v44, %v209_v43  ;;  %p1028_p6 = pnand %p1027_p5, %p1021_p2 }
  0x36   :  { %922 = vmatprep.subr.bf16.mxu0 %v1130_v25  ;;  %874 = vmatprep.subr.bf16.mxu1 %v1130_v25  ;;  %v885_v62 = vpack.c.bf16 %v219_v58, %v212_v57  ;;  %v1147_v7 = vpack.c.bf16 %v230_v51, %v223_v50 }
  0x37   :  { %v233_v2 = vand.u32 4294901760, %v232_v61 }
  0x39   :  { %924 = vmatpush3.bf16.msra.mxu0 %v1130_v25  ;;  %876 = vmatpush3.bf16.msra.mxu1 %v1130_v25  ;;  %v889_v3 = vpack.c.bf16 %v233_v2, %v226_v63 }
  0x3a   :  { %926 = vmatprep.subr.bf16.mxu0 %v1137_v30  ;;  %878 = vmatprep.subr.bf16.mxu1 %v1140_v39 }
  0xb7   :  { %v50_v8 = vpop.xlane.xlu0 %49 }
  0xb8   :  { %v55_v9 = vmul.f32 0.015625, %v50_v8 }
  0xba   :  { %v57_v11 = vadd.f32 1e-05, %v55_v9 }
  0xbb   :  { %v53_v12 = vpop.xlane.xlu0 %52 }
  0xbc   :  { %972 = vrsqrt.f32 %v57_v11  ;;  %v56_v13 = vmul.f32 0.015625, %v53_v12 }
  0xbe   :  { %v58_v14 = vadd.f32 1e-05, %v56_v13 }
  0xc0   :  { %974 = vrsqrt.f32 %v58_v14 }
  0xc6   :  { %v973_v16 = vpop.eup %972 }
  0xc7   :  { %v61_v18 = vmul.f32 %v973_v16, %v1103_v0 }
  0xc9   :  { %v70_v19 = vmul.f32 %v686_v17, %v61_v18 }
  0xca   :  { %v975_v21 = vpop.eup %974 }
  0xcb   :  { %v62_v22 = vmul.f32 %v975_v21, %v1105_v1  ;;  %v81_v23 = vsel %vm47_vm0, %v70_v19, 0 }
  0xcc   :  { %v159_v24 = vand.u32 4294901760, %v81_v23 }
  0xcd   :  { %v71_v26 = vmul.f32 %v686_v17, %v62_v22 }
  0xce   :  { %v160_v27 = vsub.f32 %v81_v23, %v159_v24 }
  0xcf   :  { %v84_v28 = vsel %vm47_vm0, %v71_v26, 0 }
  0xd0   :  { %v161_v29 = vand.u32 4294901760, %v160_v27  ;;  %v169_v31 = vand.u32 4294901760, %v84_v28 }
  0xd2   :  { %820 = vmatprep.mubr.f32.mxu0 %v161_v29  ;;  %v162_v32 = vsub.f32 %v160_v27, %v161_v29  ;;  %v170_v33 = vsub.f32 %v84_v28, %v169_v31 }
  0xd4   :  { %v163_v34 = vand.u32 4294901760, %v162_v32  ;;  %v171_v35 = vand.u32 4294901760, %v170_v33 }
  0xd6   :  { %763 = vmatprep.mubr.f32.mxu1 %v163_v34  ;;  %821 = vmatmul.mubr.f32.vlgmr.msra.gmra.mrb[0].mxu0 %v171_v35  ;;  %v172_v0 = vsub.f32 %v170_v33, %v171_v35 }
  0xd7   :  { %928 = vmatpush3.bf16.msra.mxu0 %v1137_v30  ;;  %839 = vmatprep.mubr.f32.mxu0 %v159_v24 }
  0xd8   :  { %930 = vmatprep.subr.bf16.mxu0 %v1142_v40  ;;  %v173_v1 = vand.u32 4294901760, %v172_v0 }
  0xda   :  { %764 = vmatmul.mubr.f32.vlgmr.msra.gmra.mrb[0].mxu1 %v173_v1 }
  0xdb   :  { %880 = vmatpush3.bf16.msra.mxu1 %v1140_v39  ;;  %932 = vmatpush3.bf16.msra.mxu0 %v1142_v40 }
  0xdc   :  { %782 = vmatprep.mubr.f32.mxu1 %v159_v24  ;;  %882 = vmatprep.subr.bf16.mxu1 %v881_v49 }
  0xdd   :  { %934 = vmatprep.subr.bf16.mxu0 %v933_v52 }
  0xdf   :  { %884 = vmatpush3.bf16.msra.mxu1 %v881_v49  ;;  %936 = vmatpush3.bf16.msra.mxu0 %v933_v52 }
  0xe0   :  { %886 = vmatprep.subr.bf16.mxu1 %v885_v62  ;;  %938 = vmatprep.subr.bf16.mxu0 %v937_v59 }
  0xe3   :  { %888 = vmatpush3.bf16.msra.mxu1 %v885_v62  ;;  %940 = vmatpush3.bf16.msra.mxu0 %v937_v59 }
  0xe4   :  { %890 = vmatprep.subr.bf16.mxu1 %v889_v3  ;;  %942 = vmatprep.subr.bf16.mxu0 %v1113_v10 }
  0xe6   :  { %840 = vmatmul.mubr.f32.vlgmr.msra.gmra.mrb[0].mxu0 %v169_v31 }
  0xe7   :  { %892 = vmatpush3.bf16.msra.mxu1 %v889_v3  ;;  %944 = vmatpush3.bf16.msra.mxu0 %v1113_v10 }
  0xe8   :  { %858 = vmatprep.mubr.f32.mxu0 %v159_v24  ;;  %894 = vmatprep.subr.bf16.mxu1 %v893_v4 }
  0xe9   :  { %946 = vmatprep.subr.bf16.mxu0 %v1119_v15 }
  0xea   :  { %783 = vmatmul.mubr.f32.vlgmr.msra.gmra.mrb[0].mxu1 %v169_v31 }
  0xeb   :  { %896 = vmatpush3.bf16.msra.mxu1 %v893_v4  ;;  %801 = vmatprep.mubr.f32.mxu1 %v160_v27 }
  0xec   :  { %948 = vmatpush3.bf16.msra.mxu0 %v1119_v15  ;;  %898 = vmatprep.subr.bf16.mxu1 %v897_v5 }
  0xed   :  { %950 = vmatprep.subr.bf16.mxu0 %v1125_v20 }
  0xef   :  { %900 = vmatpush3.bf16.msra.mxu1 %v897_v5 }
  0xf0   :  { %952 = vmatpush3.bf16.msra.mxu0 %v1125_v20  ;;  %902 = vmatprep.subr.bf16.mxu1 %v1145_v6 }
  0xf1   :  { %954 = vmatprep.subr.bf16.mxu0 %v1130_v25 }
  0xf3   :  { %904 = vmatpush3.bf16.msra.mxu1 %v1145_v6 }
  0xf4   :  { %956 = vmatpush3.bf16.msra.mxu0 %v1130_v25  ;;  %906 = vmatprep.subr.bf16.mxu1 %v1147_v7 }
  0xf7   :  { %859 = vmatmul.mubr.f32.vlgmr.msra.gmra.mrb[0].mxu0 %v169_v31  ;;  %908 = vmatpush3.bf16.msra.mxu1 %v1147_v7 }
  0xfa   :  { %802 = vmatmul.mubr.f32.vlgmr.msra.gmra.mrb[0].mxu1 %v170_v33 }
 0x1ca   :  { %v860_v10 = vpop.f32.mrb[0].mxu0 }
 0x1cb   :  { %v656_v15 = vpop.f32.mrb[1].mxu0 }
 0x1cd   :  { %v803_v30 = vpop.f32.mrb[0].mxu1 }
 0x1ce   :  { %v957_v20 = vadd.f32 %v860_v10, %v803_v30  ;;  %v380_v36 = vpop.f32.mrb[1].mxu1 }
 0x1cf   :  { %v958_v37 = vadd.f32 %v656_v15, %v380_v36 }
 0x1d0   :  { %667 = vst [vmem:[#allocation7 + $0x8] sm:$0xff] %v957_v20 }
 0x1d1   :  { %666 = vst [vmem:[#allocation7] sm:$0xff] %v958_v37 }
 0x1d2   :  { %1031 = shalt.err (!%p1028_p6)
}
 0x1d3   :  { %s1032_s15 = scalar_lea.hbm %s1190_s3, 256 }
 0x1d4   :  { %p1033_p7 = scmp.ne.s32.totalorder %s1190_s3, %s1032_s15  ;;  %p1036_p8 = scmp.lt.u32.totalorder %s1032_s15, %s1190_s3 }
 0x1d6   :  { %p1038_p9 = pnand %p1036_p8, %p1033_p7 }
 0x1d8   :  { %1041 = shalt.err (!%p1038_p9)
}
 0x1d9   :  { %679 = dma.vmem_to_hbm [thread:$0]  %s674_s11, 256, %s1190_s3, [#allocation4], %s1049_s22, %s1049_s22, %s1050_s23  }
 0x1da   :  { %1046 = dma.done.wait [#allocation4], 256  }
 0x1db   :  { %1047 = vsyncadd [#allocation4], 4294967040 }
 0x1dc   :  { %683 = vsyncpa [#allocation3], 1 }
 0x1dd   :  { %684 = vsyncpa [#allocation6], 1 }
 0x1de   :  { %685 = vsyncpa [#allocation4], 1 }

</bundles_post_ra>
